<compile_context>
chip_gen: v6e
topology: v6e:2x2x1
jax: 0.10.0
libtpu: 0.0.40
codegen_flags: <defaults>
</compile_context>

<pallas_src>
import numpy as np
import jax
import jax.numpy as jnp
from jax.experimental import pallas as pl
from jax.experimental.pallas import tpu as pltpu  # noqa: F401  (TPU backend)

# ---- config: FeedForward(dim=32, hidden_dim=None, multiple_of=8, dropout=0.0) ----
B, S, D = 2, 8, 32
MULTIPLE_OF = 8
_hd = int(2 * (4 * D) / 3)
HIDDEN_DIM = MULTIPLE_OF * ((_hd + MULTIPLE_OF - 1) // MULTIPLE_OF)   # 88
HIDDEN_PAD = 128           # zero-pad hidden dim to a full 128-lane width
M = B * S                  # flattened rows; single block, single step
# TODO(synk): nn.Dropout is treated as eval-mode (p=0), i.e. identity.


def ffn_kernel(x_ref, w13_ref, w2_ref, o_ref):
    x = x_ref[...].astype(jnp.bfloat16)                                      # (M, D)
    y = jnp.dot(x, w13_ref[...], preferred_element_type=jnp.float32)         # (M, 2*HP)
    g = y[:, :HIDDEN_PAD]                                                    # w1(x)
    u = y[:, HIDDEN_PAD:]                                                    # w3(x)
    h = (g * jax.lax.logistic(g) * u).astype(jnp.bfloat16)                   # silu(g)*u, f32 math
    o_ref[...] = jnp.dot(h, w2_ref[...],
                         preferred_element_type=jnp.float32).astype(o_ref.dtype)


def prepack_params(params):
    """One-time weight prepack: pad hidden 88->128, fuse w1|w3, cast to bf16."""
    w13 = jnp.zeros((D, 2 * HIDDEN_PAD), jnp.bfloat16)
    w13 = w13.at[:, :HIDDEN_DIM].set(params["w1_t"].astype(jnp.bfloat16))
    w13 = w13.at[:, HIDDEN_PAD:HIDDEN_PAD + HIDDEN_DIM].set(
        params["w3_t"].astype(jnp.bfloat16))
    w2p = jnp.zeros((HIDDEN_PAD, D), jnp.bfloat16).at[:HIDDEN_DIM, :].set(
        params["w2_t"].astype(jnp.bfloat16))
    return {"w13": w13, "w2": w2p}


def feed_forward(x, packed):
    Bx, Sx, Dx = x.shape
    xf = x.reshape(Bx * Sx, Dx)                    # (16, 32) -> one block, one step
    out = pl.pallas_call(
        ffn_kernel,
        out_shape=jax.ShapeDtypeStruct((Bx * Sx, Dx), x.dtype),
        # no grid: single invocation, whole arrays resident in VMEM (~30 KB)
    )(xf, packed["w13"], packed["w2"])
    return out.reshape(Bx, Sx, Dx)


# ------------- pure-JAX f32 reference (mirrors the PyTorch forward) -------------
def reference_ffn(x, p):
    g = x @ p["w1_t"]
    return (g * jax.nn.sigmoid(g)) * (x @ p["w3_t"]) @ p["w2_t"]


if __name__ == "__main__":
    key = jax.random.PRNGKey(0)
    ks = jax.random.split(key, 4)
    params = {
        "w1_t": jax.random.normal(ks[0], (D, HIDDEN_DIM), jnp.float32) * 0.05,
        "w2_t": jax.random.normal(ks[1], (HIDDEN_DIM, D), jnp.float32) * 0.05,
        "w3_t": jax.random.normal(ks[2], (D, HIDDEN_DIM), jnp.float32) * 0.05,
    }
    x = jax.random.normal(ks[3], (B, S, D), jnp.float32)

    packed = jax.block_until_ready(prepack_params(params))   # one-time prepack

    out = jax.block_until_ready(feed_forward(x, packed))
    ref = reference_ffn(x, params)
    # bf16 MXU operands -> loosened tolerance.
    np.testing.assert_allclose(np.asarray(out), np.asarray(ref), rtol=2e-2, atol=2e-2)
    print("KERNEL_OK")
</pallas_src>

<mosaic_0001>
module attributes {stable_mosaic.version = 11 : i64} {
  func.func @ffn_kernel(%arg0: memref<16x32xf32, #tpu.memory_space<vmem>>, %arg1: memref<32x256xbf16, #tpu.memory_space<vmem>>, %arg2: memref<128x32xbf16, #tpu.memory_space<vmem>>, %arg3: memref<16x32xf32, #tpu.memory_space<vmem>>) attributes {dimension_semantics = [], scalar_prefetch = 0 : i64, scratch_operands = 0 : i64, tpu.core_type = #tpu.core_type<tc>} {
    %c0 = arith.constant 0 : index
    %c0_0 = arith.constant 0 : index
    %0 = vector.load %arg0[%c0, %c0_0] : memref<16x32xf32, #tpu.memory_space<vmem>>, vector<16x32xf32>
    %1 = arith.truncf %0 : vector<16x32xf32> to vector<16x32xbf16>
    %c0_1 = arith.constant 0 : index
    %c0_2 = arith.constant 0 : index
    %2 = vector.load %arg1[%c0_1, %c0_2] : memref<32x256xbf16, #tpu.memory_space<vmem>>, vector<32x256xbf16>
    %cst = arith.constant dense<0.000000e+00> : vector<16x256xf32>
    %3 = tpu.matmul %1, %2, %cst {dimension_numbers = #tpu.dot_dimension_numbers<[1], [0], [0], [1], [0, 0, 1, 1], [], []>} : vector<16x32xbf16>, vector<32x256xbf16>, vector<16x256xf32> -> vector<16x256xf32>
    %4 = vector.extract_strided_slice %3 {offsets = [0, 0], sizes = [16, 128], strides = [1, 1]} : vector<16x256xf32> to vector<16x128xf32>
    %5 = vector.extract_strided_slice %3 {offsets = [0, 128], sizes = [16, 128], strides = [1, 1]} : vector<16x256xf32> to vector<16x128xf32>
    %6 = arith.negf %4 : vector<16x128xf32>
    %7 = math.exp %6 : vector<16x128xf32>
    %cst_3 = arith.constant 1.000000e+00 : f32
    %8 = vector.broadcast %cst_3 : f32 to vector<16x128xf32>
    %9 = arith.addf %8, %7 : vector<16x128xf32>
    %10 = arith.divf %8, %9 : vector<16x128xf32>
    %11 = arith.mulf %4, %10 : vector<16x128xf32>
    %12 = arith.mulf %11, %5 : vector<16x128xf32>
    %13 = arith.truncf %12 : vector<16x128xf32> to vector<16x128xbf16>
    %c0_4 = arith.constant 0 : index
    %c0_5 = arith.constant 0 : index
    %14 = vector.load %arg2[%c0_4, %c0_5] : memref<128x32xbf16, #tpu.memory_space<vmem>>, vector<128x32xbf16>
    %cst_6 = arith.constant dense<0.000000e+00> : vector<16x32xf32>
    %15 = tpu.matmul %13, %14, %cst_6 {dimension_numbers = #tpu.dot_dimension_numbers<[1], [0], [0], [1], [0, 0, 1, 1], [], []>} : vector<16x128xbf16>, vector<128x32xbf16>, vector<16x32xf32> -> vector<16x32xf32>
    %c0_7 = arith.constant 0 : index
    %c0_8 = arith.constant 0 : index
    %16 = vector.load %arg3[%c0_7, %c0_8] : memref<16x32xf32, #tpu.memory_space<vmem>>, vector<16x32xf32>
    tpu.vector_store %arg3[%c0_7, %c0_8], %15 {strides = array<i32>} : memref<16x32xf32, #tpu.memory_space<vmem>>, vector<16x32xf32>,
    return
  }
}

</mosaic_0001>

<bundles_post_ra>
// kernel: tpu_custom_call.1
= control target key start
LH: loop header
LB: loop body
LE: loop exit
PB: predicated region body
PF: predicated region fallthrough
CT: control target
= control target key end

     0   :  { %v324_v2 = vmov 0   ;;  %vm43_vm0 = vcmask 261120   ;;  %s398_s0 = inlined_call_operand.vmem [shape: f32[16,32], index: 0, kind: input, shape index: {}]   ;;  %s399_s1 = inlined_call_operand.vmem [shape: bf16[32,256], index: 1, kind: input, shape index: {}]   ;;  %s400_s2 = inlined_call_operand.vmem [shape: bf16[128,32], index: 2, kind: input, shape index: {}]   ;;  %s401_s3 = inlined_call_operand.hbm [shape: f32[16,32], index: 3, kind: output, shape index: {}]  }
   0x1   :  { %v280_v0 = vld [vmem:[%s399_s1 + $0x14] ss:$8 sps:$4 sm:$0xff]   ;;  %v282_v1 = vld [vmem:[%s399_s1 + $0x10] ss:$8 sps:$4 sm:$0xff]   ;;  %79 = vmatprep.mubr.bf16.mxu0 %v324_v2  ;;  %v283_v3 = vld [vmem:[%s399_s1 + $0x4] ss:$8 sps:$4 sm:$0xff]  }
   0x2   :  { %59 = vmatprep.subr.bf16.mxu0 %v280_v0  ;;  %v285_v4 = vld [vmem:[%s399_s1] ss:$8 sps:$4 sm:$0xff]  }
   0x3   :  { %v16_v5 = vld [vmem:[%s398_s0] sm:$0xff]  ;;  %60 = vmatpush1.bf16.msra.mxu0 %v282_v1  ;;  %v17_v6 = vld [vmem:[%s398_s0 + $0x8] sm:$0xff] }
   0x4   :  { %61 = vmatprep.subr.bf16.mxu0 %v283_v3  ;;  %v18_v7 = vpack.c.bf16 %v17_v6, %v16_v5 }
   0x7   :  { %62 = vmatpush1.bf16.msra.mxu0 %v285_v4 }
   0x8   :  { %8 = vsyncpa [#allocation3], 0  ;;  %v286_v8 = vld [vmem:[%s400_s2 + $0x38] sm:$0xff]   ;;  %v325_v9 = vmov 0.0   ;;  %v287_v10 = vld [vmem:[%s400_s2 + $0x30] sm:$0xff]   ;;  %vm326_vm1 = vmmov 0  }
   0x9   :  { %254 = vmatprep.subr.bf16.mxu1 %v325_v9  ;;  %v288_v11 = vld [vmem:[%s400_s2 + $0x28] sm:$0xff]   ;;  %v289_v12 = vld [vmem:[%s400_s2 + $0x20] sm:$0xff]   ;;  %v290_v13 = vld [vmem:[%s400_s2 + $0x18] sm:$0xff]   ;;  %270 = vmatprep.mubr.msk.bf16.mxu1 %vm326_vm1, %v325_v9 }
   0xa   :  { %234 = vmatmul.mubr.msk.bf16.vlgmr.msra.gmra.mxu0 %vm43_vm0, %v18_v7  ;;  %255 = vmatpush3.bf16.msra.mxu1 %v286_v8  ;;  %v291_v14 = vld [vmem:[%s400_s2 + $0x10] sm:$0xff]   ;;  %v292_v15 = vld [vmem:[%s400_s2 + $0x8] sm:$0xff]   ;;  %v293_v16 = vld [vmem:[%s400_s2] sm:$0xff]   ;;  %s327_s2 = smov [#allocation2]  }
   0xb   :  { %256 = vmatprep.subr.bf16.mxu1 %v325_v9  ;;  %s219_s11 = sshll.u32 %s327_s2, 4  ;;  %s220_s11 = int_to_ptr.vmem [resolvable:$true] %s219_s11 }
   0xc   :  { %s302_s12 = scalar_lea.vmem %s220_s11, 256  ;;  %p307_p1 = scmp.lt.s32.totalorder %s220_s11, %s220_s11 }
   0xd   :  { %p303_p0 = scmp.ne.s32.totalorder %s220_s11, %s302_s12  ;;  %p308_p2 = scmp.lt.s32.totalorder %s302_s12, %s302_s12 }
   0xe   :  { %257 = vmatpush3.bf16.msra.mxu1 %v287_v10 }
   0xf   :  { %258 = vmatprep.subr.bf16.mxu1 %v325_v9  ;;  %p309_p3 = por %p308_p2, %p307_p1 }
  0x11   :  { %p310_p4 = pnand %p309_p3, %p303_p0 }
  0x12   :  { %259 = vmatpush3.bf16.msra.mxu1 %v288_v11 }
  0x13   :  { %260 = vmatprep.subr.bf16.mxu1 %v325_v9 }
  0x16   :  { %261 = vmatpush3.bf16.msra.mxu1 %v289_v12 }
  0x17   :  { %262 = vmatprep.subr.bf16.mxu1 %v325_v9 }
  0x1a   :  { %263 = vmatpush3.bf16.msra.mxu1 %v290_v13 }
  0x1b   :  { %264 = vmatprep.subr.bf16.mxu1 %v325_v9 }
  0x1e   :  { %265 = vmatpush3.bf16.msra.mxu1 %v291_v14 }
  0x1f   :  { %266 = vmatprep.subr.bf16.mxu1 %v325_v9 }
  0x22   :  { %267 = vmatpush3.bf16.msra.mxu1 %v292_v15 }
  0x23   :  { %268 = vmatprep.subr.bf16.mxu1 %v325_v9 }
  0x26   :  { %269 = vmatpush3.bf16.msra.mxu1 %v293_v16 }
  0xca   :  { %v81_v17 = vpop.f32.mrf.mxu0 }
  0xcb   :  { %v235_v18 = vmul.f32 -1.442695, %v81_v17 }
  0xcc   :  { %v83_v19 = vpop.f32.mrf.mxu0 }
  0xcd   :  { %294 = vpow2.f32 %v235_v18 }
  0xce   :  { %v85_v20 = vpop.f32.mrf.mxu0 }
  0xcf   :  { %v236_v21 = vmul.f32 -1.442695, %v85_v20 }
  0xd0   :  { %v87_v30 = vpop.f32.mrf.mxu0 }
  0xd1   :  { %296 = vpow2.f32 %v236_v21 }
  0xda   :  { %v295_v22 = vpop.eup %294 }
  0xdb   :  { %v96_v23 = vadd.f32 1.0, %v295_v22 }
  0xdd   :  { %298 = vrcp.f32 %v96_v23 }
  0xde   :  { %v297_v24 = vpop.eup %296 }
  0xdf   :  { %v97_v25 = vadd.f32 1.0, %v297_v24 }
  0xe1   :  { %300 = vrcp.f32 %v97_v25 }
  0xea   :  { %v299_v26 = vpop.eup %298 }
  0xeb   :  { %v102_v27 = vmul.f32 %v299_v26, %v81_v17 }
  0xed   :  { %v104_v31 = vmul.f32 %v102_v27, %v83_v19 }
  0xee   :  { %v301_v28 = vpop.eup %300 }
  0xef   :  { %v103_v29 = vmul.f32 %v301_v28, %v85_v20 }
  0xf1   :  { %v105_v32 = vmul.f32 %v103_v29, %v87_v30 }
  0xf3   :  { %v106_v33 = vpack.c.bf16 %v105_v32, %v104_v31 }
  0xf5   :  { %271 = vmatmul.mubr.bf16.vlgmr.msra.gmra.mxu1 %v106_v33 }
 0x1b5   :  { %v205_v34 = vpop.f32.mrf.mxu1 }
 0x1b6   :  { %212 = vst.msk [vmem:[#allocation2] sm:$0xff] %vm43_vm0, %v205_v34 }
 0x1b7   :  { %v272_v35 = vpop.f32.mrf.mxu1 }
 0x1b9   :  { %v208_v36 = vpop.f32.mrf.mxu1 }
 0x1ba   :  { %213 = vst.msk [vmem:[#allocation2 + $0x8] sm:$0xff] %vm43_vm0, %v208_v36 }
 0x1bb   :  { %v273_v37 = vpop.f32.mrf.mxu1 }
 0x1bc   :  { %313 = shalt.err (!%p310_p4)
}
 0x1bd   :  { %s328_s13 = smov 128   ;;  %s329_s14 = smov 8  }
 0x1be   :  { %225 = dma.vmem_to_hbm [thread:$0]  %s220_s11, 256, %s401_s3, [#allocation3], %s328_s13, %s328_s13, %s329_s14  }
 0x1bf   :  { %322 = dma.done.wait [#allocation3], 256  }
 0x1c0   :  { %323 = vsyncadd [#allocation3], 4294967040 }
 0x1c1   :  { %229 = vsyncpa [#allocation3], 1 }

</bundles_post_ra>
